<compile_context>
chip_gen: v7x
topology: tpu7x:2x2x1
jax: 0.10.0
libtpu: 0.0.40
codegen_flags: <defaults>
</compile_context>

<pallas_src>
import functools

import jax
import jax.numpy as jnp
from jax.experimental import pallas as pl
from jax.experimental.pallas import tpu as pltpu


def _round_up(x, m):
    return (x + m - 1) // m * m


def _cross_attention_kernel(x_ref, ctx_ref, wq_ref, wk_ref, wv_ref, wo_ref,
                            bo_ref, o_ref, *, heads):
    # x_ref:  (block_n, Dq_p)        ctx_ref: (M, Dc_p)
    # wq_ref: (H, Dq_p, d)           wk_ref/wv_ref: (H, Dc_p, d)
    # wo_ref: (H, d, Dq_p)           bo_ref: (1, Dq_p)
    # o_ref:  (block_n, Dq_p)
    x = x_ref[...]          # keep source dtype for MXU inputs
    c = ctx_ref[...]

    acc = jnp.zeros(o_ref.shape, jnp.float32)

    # heads is a small static int -> unrolled Python loop; weights are already
    # per-head slabs, so no lane slicing / concat happens in-kernel.
    for h in range(heads):
        # Projections (scale already folded into wq).  f32 accumulation.
        q_h = jnp.dot(x, wq_ref[h], preferred_element_type=jnp.float32)   # (bn, d)
        k_h = jnp.dot(c, wk_ref[h], preferred_element_type=jnp.float32)   # (M, d)
        v_h = jnp.dot(c, wv_ref[h], preferred_element_type=jnp.float32)   # (M, d)

        # Scores: contract last dims directly (no materialized transpose).
        sim = jax.lax.dot_general(q_h, k_h, (((1,), (1,)), ((), ())),
                                  preferred_element_type=jnp.float32)     # (bn, M)

        # Numerically-stable softmax in f32; reciprocal on the EUP.
        sim = sim - jnp.max(sim, axis=-1, keepdims=True)
        p = jnp.exp(sim)
        p = p * pl.reciprocal(jnp.sum(p, axis=-1, keepdims=True), approx=True)

        o_h = jnp.dot(p, v_h, preferred_element_type=jnp.float32)         # (bn, d)

        # Fused per-head output projection -> accumulate (no concat).
        acc = acc + jnp.dot(o_h, wo_ref[h], preferred_element_type=jnp.float32)

    o_ref[...] = (acc + bo_ref[...].astype(jnp.float32)).astype(o_ref.dtype)


def cross_attention(x, context, params, *, heads, dim_head, block_n=256):
    """x: (B, N, query_dim), context: (B, M, context_dim) -> (B, N, query_dim)."""
    wq, wk, wv, wo, bo = (params["wq"], params["wk"], params["wv"],
                          params["wo"], params["bo"])
    B, N, Dq = x.shape
    _, M, Dc = context.shape
    scale = float(dim_head) ** (-0.5)

    # Lane-dense padding of feature dims; sequence tile multiple of 8.
    Dq_p = _round_up(Dq, 128)
    Dc_p = _round_up(Dc, 128)
    bn = min(block_n, _round_up(N, 8))
    N_p = _round_up(N, bn)

    x_p = jnp.pad(x, ((0, 0), (0, N_p - N), (0, Dq_p - Dq)))
    ctx_p = jnp.pad(context, ((0, 0), (0, 0), (0, Dc_p - Dc)))

    # Per-head, pre-transposed weight slabs (PyTorch weights are (out, in)).
    # Softmax scale folded into the Q projection.
    wqT = (wq * scale).reshape(heads, dim_head, Dq).transpose(0, 2, 1)   # (H, Dq, d)
    wkT = wk.reshape(heads, dim_head, Dc).transpose(0, 2, 1)             # (H, Dc, d)
    wvT = wv.reshape(heads, dim_head, Dc).transpose(0, 2, 1)             # (H, Dc, d)
    woT = wo.reshape(Dq, heads, dim_head).transpose(1, 2, 0)             # (H, d, Dq)

    wqT = jnp.pad(wqT, ((0, 0), (0, Dq_p - Dq), (0, 0)))
    wkT = jnp.pad(wkT, ((0, 0), (0, Dc_p - Dc), (0, 0)))
    wvT = jnp.pad(wvT, ((0, 0), (0, Dc_p - Dc), (0, 0)))
    woT = jnp.pad(woT, ((0, 0), (0, 0), (0, Dq_p - Dq)))
    bo2 = jnp.pad(bo.reshape(1, Dq), ((0, 0), (0, Dq_p - Dq)))

    kernel = functools.partial(_cross_attention_kernel, heads=heads)

    out_p = pl.pallas_call(
        kernel,
        out_shape=jax.ShapeDtypeStruct((B, N_p, Dq_p), x.dtype),
        grid_spec=pltpu.PrefetchScalarGridSpec(
            num_scalar_prefetch=0,
            grid=(B, N_p // bn),
            in_specs=[
                # batch dim squeezed -> kernel sees clean 2-D tiles
                pl.BlockSpec((None, bn, Dq_p), lambda b, i: (b, i, 0)),        # x tile
                pl.BlockSpec((None, M, Dc_p), lambda b, i: (b, 0, 0)),         # context
                pl.BlockSpec((heads, Dq_p, dim_head), lambda b, i: (0, 0, 0)),  # wqT (scaled)
                pl.BlockSpec((heads, Dc_p, dim_head), lambda b, i: (0, 0, 0)),  # wkT
                pl.BlockSpec((heads, Dc_p, dim_head), lambda b, i: (0, 0, 0)),  # wvT
                pl.BlockSpec((heads, dim_head, Dq_p), lambda b, i: (0, 0, 0)),  # woT
                pl.BlockSpec((1, Dq_p), lambda b, i: (0, 0)),                   # bias
            ],
            out_specs=pl.BlockSpec((None, bn, Dq_p), lambda b, i: (b, i, 0)),
        ),
        compiler_params=pltpu.CompilerParams(
            dimension_semantics=("parallel", "parallel")),
    )(x_p, ctx_p, wqT, wkT, wvT, woT, bo2)

    return out_p[:, :N, :Dq]


def reference_cross_attention(x, context, params, *, heads, dim_head):
    """Pure-JAX reference mirroring the PyTorch forward (mask=None)."""
    wq, wk, wv, wo, bo = (params["wq"], params["wk"], params["wv"],
                          params["wo"], params["bo"])
    B, N, _ = x.shape
    _, M, _ = context.shape
    scale = float(dim_head) ** (-0.5)
    q = jnp.einsum("bnd,id->bni", x, wq)
    k = jnp.einsum("bmd,id->bmi", context, wk)
    v = jnp.einsum("bmd,id->bmi", context, wv)
    q = q.reshape(B, N, heads, dim_head).transpose(0, 2, 1, 3)
    k = k.reshape(B, M, heads, dim_head).transpose(0, 2, 1, 3)
    v = v.reshape(B, M, heads, dim_head).transpose(0, 2, 1, 3)
    sim = jnp.einsum("bhid,bhjd->bhij", q, k) * scale
    attn = jax.nn.softmax(sim, axis=-1)
    out = jnp.einsum("bhij,bhjd->bhid", attn, v)
    out = out.transpose(0, 2, 1, 3).reshape(B, N, heads * dim_head)
    return jnp.einsum("bni,oi->bno", out, wo) + bo


if __name__ == "__main__":
    # Small shapes consistent with the module's forward.
    B, N, M = 2, 8, 8
    query_dim, context_dim = 32, 32
    heads, dim_head = 2, 16
    inner_dim = heads * dim_head

    key = jax.random.PRNGKey(0)
    kx, kc, k1, k2, k3, k4, k5 = jax.random.split(key, 7)

    x = jax.random.normal(kx, (B, N, query_dim), dtype=jnp.float32)
    context = jax.random.normal(kc, (B, M, context_dim), dtype=jnp.float32)

    # Deterministic parameter init (PyTorch Linear weight shape: (out, in)).
    params = {
        "wq": jax.random.normal(k1, (inner_dim, query_dim), jnp.float32) * 0.1,
        "wk": jax.random.normal(k2, (inner_dim, context_dim), jnp.float32) * 0.1,
        "wv": jax.random.normal(k3, (inner_dim, context_dim), jnp.float32) * 0.1,
        "wo": jax.random.normal(k4, (query_dim, inner_dim), jnp.float32) * 0.1,
        "bo": jax.random.normal(k5, (query_dim,), jnp.float32) * 0.1,
    }

    out = cross_attention(x, context, params, heads=heads, dim_head=dim_head)
    out = jax.block_until_ready(out)

    ref = reference_cross_attention(x, context, params, heads=heads, dim_head=dim_head)
    assert out.shape == (B, N, query_dim)
    # Slightly loosened tolerance vs f32 reference: approx reciprocal (EUP) +
    # MXU f32 accumulation path.
    assert jnp.allclose(out, ref, atol=2e-3, rtol=2e-3), "mismatch vs reference"

    print("KERNEL_OK")
</pallas_src>

<mosaic_0001>
module attributes {stable_mosaic.version = 11 : i64} {
  func.func @_cross_attention_kernel(%arg0: i32, %arg1: i32, %arg2: memref<1x8x128xf32, #tpu.memory_space<vmem>>, %arg3: memref<1x8x128xf32, #tpu.memory_space<vmem>>, %arg4: memref<2x128x16xf32, #tpu.memory_space<vmem>>, %arg5: memref<2x128x16xf32, #tpu.memory_space<vmem>>, %arg6: memref<2x128x16xf32, #tpu.memory_space<vmem>>, %arg7: memref<2x16x128xf32, #tpu.memory_space<vmem>>, %arg8: memref<1x128xf32, #tpu.memory_space<vmem>>, %arg9: memref<1x8x128xf32, #tpu.memory_space<vmem>>) attributes {dimension_semantics = [#tpu.dimension_semantics<parallel>, #tpu.dimension_semantics<parallel>], iteration_bounds = array<i64: 2, 1>, scalar_prefetch = 0 : i64, scratch_operands = 0 : i64, tpu.core_type = #tpu.core_type<tc>, window_params = [{transform_indices = @transform_0, window_bounds = array<i64: 1, 8, 128>}, {transform_indices = @transform_1, window_bounds = array<i64: 1, 8, 128>}, {pipeline_mode = #tpu.pipeline_mode<synchronous>, transform_indices = @transform_2, window_bounds = array<i64: 2, 128, 16>}, {pipeline_mode = #tpu.pipeline_mode<synchronous>, transform_indices = @transform_3, window_bounds = array<i64: 2, 128, 16>}, {pipeline_mode = #tpu.pipeline_mode<synchronous>, transform_indices = @transform_4, window_bounds = array<i64: 2, 128, 16>}, {pipeline_mode = #tpu.pipeline_mode<synchronous>, transform_indices = @transform_5, window_bounds = array<i64: 2, 16, 128>}, {pipeline_mode = #tpu.pipeline_mode<synchronous>, transform_indices = @transform_6, window_bounds = array<i64: 1, 128>}, {transform_indices = @transform_7, window_bounds = array<i64: 1, 8, 128>}]} {
    %c0 = arith.constant 0 : index
    %c0_0 = arith.constant 0 : index
    %c0_1 = arith.constant 0 : index
    %0 = vector.load %arg2[%c0, %c0_0, %c0_1] : memref<1x8x128xf32, #tpu.memory_space<vmem>>, vector<1x8x128xf32>
    %1 = vector.shape_cast %0 : vector<1x8x128xf32> to vector<8x128xf32>
    %c0_2 = arith.constant 0 : index
    %c0_3 = arith.constant 0 : index
    %c0_4 = arith.constant 0 : index
    %2 = vector.load %arg3[%c0_2, %c0_3, %c0_4] : memref<1x8x128xf32, #tpu.memory_space<vmem>>, vector<1x8x128xf32>
    %3 = vector.shape_cast %2 : vector<1x8x128xf32> to vector<8x128xf32>
    %cst = arith.constant 0.000000e+00 : f32
    %4 = vector.broadcast %cst : f32 to vector<8x128xf32>
    %c0_5 = arith.constant 0 : index
    %c0_6 = arith.constant 0 : index
    %c0_7 = arith.constant 0 : index
    %5 = vector.load %arg4[%c0_5, %c0_6, %c0_7] : memref<2x128x16xf32, #tpu.memory_space<vmem>>, vector<1x128x16xf32>
    %6 = vector.shape_cast %5 : vector<1x128x16xf32> to vector<128x16xf32>
    %cst_8 = arith.constant dense<0.000000e+00> : vector<8x16xf32>
    %7 = tpu.matmul %1, %6, %cst_8 {dimension_numbers = #tpu.dot_dimension_numbers<[1], [0], [0], [1], [0, 0, 1, 1], [], []>} : vector<8x128xf32>, vector<128x16xf32>, vector<8x16xf32> -> vector<8x16xf32>
    %c0_9 = arith.constant 0 : index
    %c0_10 = arith.constant 0 : index
    %c0_11 = arith.constant 0 : index
    %8 = vector.load %arg5[%c0_9, %c0_10, %c0_11] : memref<2x128x16xf32, #tpu.memory_space<vmem>>, vector<1x128x16xf32>
    %9 = vector.shape_cast %8 : vector<1x128x16xf32> to vector<128x16xf32>
    %cst_12 = arith.constant dense<0.000000e+00> : vector<8x16xf32>
    %10 = tpu.matmul %3, %9, %cst_12 {dimension_numbers = #tpu.dot_dimension_numbers<[1], [0], [0], [1], [0, 0, 1, 1], [], []>} : vector<8x128xf32>, vector<128x16xf32>, vector<8x16xf32> -> vector<8x16xf32>
    %c0_13 = arith.constant 0 : index
    %c0_14 = arith.constant 0 : index
    %c0_15 = arith.constant 0 : index
    %11 = vector.load %arg6[%c0_13, %c0_14, %c0_15] : memref<2x128x16xf32, #tpu.memory_space<vmem>>, vector<1x128x16xf32>
    %12 = vector.shape_cast %11 : vector<1x128x16xf32> to vector<128x16xf32>
    %cst_16 = arith.constant dense<0.000000e+00> : vector<8x16xf32>
    %13 = tpu.matmul %3, %12, %cst_16 {dimension_numbers = #tpu.dot_dimension_numbers<[1], [0], [0], [1], [0, 0, 1, 1], [], []>} : vector<8x128xf32>, vector<128x16xf32>, vector<8x16xf32> -> vector<8x16xf32>
    %cst_17 = arith.constant dense<0.000000e+00> : vector<8x8xf32>
    %14 = tpu.matmul %7, %10, %cst_17 {dimension_numbers = #tpu.dot_dimension_numbers<[1], [1], [0], [0], [0, 0, 1, 0], [], []>} : vector<8x16xf32>, vector<8x16xf32>, vector<8x8xf32> -> vector<8x8xf32>
    %cst_18 = arith.constant dense<0xFF800000> : vector<8xf32>
    %15 = vector.multi_reduction <maximumf>, %14, %cst_18 [1] : vector<8x8xf32> to vector<8xf32>
    %16 = vector.shape_cast %15 : vector<8xf32> to vector<8x1xf32>
    %17 = vector.broadcast %16 : vector<8x1xf32> to vector<8x8xf32>
    %18 = arith.subf %14, %17 : vector<8x8xf32>
    %19 = math.exp %18 : vector<8x8xf32>
    %cst_19 = arith.constant dense<0.000000e+00> : vector<8xf32>
    %20 = vector.multi_reduction <add>, %19, %cst_19 [1] : vector<8x8xf32> to vector<8xf32>
    %21 = vector.shape_cast %20 : vector<8xf32> to vector<8x1xf32>
    %22 = tpu.reciprocal %21 {approx = true} : vector<8x1xf32> -> vector<8x1xf32>
    %23 = vector.broadcast %22 : vector<8x1xf32> to vector<8x8xf32>
    %24 = arith.mulf %19, %23 : vector<8x8xf32>
    %cst_20 = arith.constant dense<0.000000e+00> : vector<8x16xf32>
    %25 = tpu.matmul %24, %13, %cst_20 {dimension_numbers = #tpu.dot_dimension_numbers<[1], [0], [0], [1], [0, 0, 1, 1], [], []>} : vector<8x8xf32>, vector<8x16xf32>, vector<8x16xf32> -> vector<8x16xf32>
    %c0_21 = arith.constant 0 : index
    %c0_22 = arith.constant 0 : index
    %c0_23 = arith.constant 0 : index
    %26 = vector.load %arg7[%c0_21, %c0_22, %c0_23] : memref<2x16x128xf32, #tpu.memory_space<vmem>>, vector<1x16x128xf32>
    %27 = vector.shape_cast %26 : vector<1x16x128xf32> to vector<16x128xf32>
    %cst_24 = arith.constant dense<0.000000e+00> : vector<8x128xf32>
    %28 = tpu.matmul %25, %27, %cst_24 {dimension_numbers = #tpu.dot_dimension_numbers<[1], [0], [0], [1], [0, 0, 1, 1], [], []>} : vector<8x16xf32>, vector<16x128xf32>, vector<8x128xf32> -> vector<8x128xf32>
    %29 = arith.addf %4, %28 : vector<8x128xf32>
    %c1 = arith.constant 1 : index
    %c0_25 = arith.constant 0 : index
    %c0_26 = arith.constant 0 : index
    %30 = vector.load %arg4[%c1, %c0_25, %c0_26] : memref<2x128x16xf32, #tpu.memory_space<vmem>>, vector<1x128x16xf32>
    %31 = vector.shape_cast %30 : vector<1x128x16xf32> to vector<128x16xf32>
    %cst_27 = arith.constant dense<0.000000e+00> : vector<8x16xf32>
    %32 = tpu.matmul %1, %31, %cst_27 {dimension_numbers = #tpu.dot_dimension_numbers<[1], [0], [0], [1], [0, 0, 1, 1], [], []>} : vector<8x128xf32>, vector<128x16xf32>, vector<8x16xf32> -> vector<8x16xf32>
    %c1_28 = arith.constant 1 : index
    %c0_29 = arith.constant 0 : index
    %c0_30 = arith.constant 0 : index
    %33 = vector.load %arg5[%c1_28, %c0_29, %c0_30] : memref<2x128x16xf32, #tpu.memory_space<vmem>>, vector<1x128x16xf32>
    %34 = vector.shape_cast %33 : vector<1x128x16xf32> to vector<128x16xf32>
    %cst_31 = arith.constant dense<0.000000e+00> : vector<8x16xf32>
    %35 = tpu.matmul %3, %34, %cst_31 {dimension_numbers = #tpu.dot_dimension_numbers<[1], [0], [0], [1], [0, 0, 1, 1], [], []>} : vector<8x128xf32>, vector<128x16xf32>, vector<8x16xf32> -> vector<8x16xf32>
    %c1_32 = arith.constant 1 : index
    %c0_33 = arith.constant 0 : index
    %c0_34 = arith.constant 0 : index
    %36 = vector.load %arg6[%c1_32, %c0_33, %c0_34] : memref<2x128x16xf32, #tpu.memory_space<vmem>>, vector<1x128x16xf32>
    %37 = vector.shape_cast %36 : vector<1x128x16xf32> to vector<128x16xf32>
    %cst_35 = arith.constant dense<0.000000e+00> : vector<8x16xf32>
    %38 = tpu.matmul %3, %37, %cst_35 {dimension_numbers = #tpu.dot_dimension_numbers<[1], [0], [0], [1], [0, 0, 1, 1], [], []>} : vector<8x128xf32>, vector<128x16xf32>, vector<8x16xf32> -> vector<8x16xf32>
    %cst_36 = arith.constant dense<0.000000e+00> : vector<8x8xf32>
    %39 = tpu.matmul %32, %35, %cst_36 {dimension_numbers = #tpu.dot_dimension_numbers<[1], [1], [0], [0], [0, 0, 1, 0], [], []>} : vector<8x16xf32>, vector<8x16xf32>, vector<8x8xf32> -> vector<8x8xf32>
    %cst_37 = arith.constant dense<0xFF800000> : vector<8xf32>
    %40 = vector.multi_reduction <maximumf>, %39, %cst_37 [1] : vector<8x8xf32> to vector<8xf32>
    %41 = vector.shape_cast %40 : vector<8xf32> to vector<8x1xf32>
    %42 = vector.broadcast %41 : vector<8x1xf32> to vector<8x8xf32>
    %43 = arith.subf %39, %42 : vector<8x8xf32>
    %44 = math.exp %43 : vector<8x8xf32>
    %cst_38 = arith.constant dense<0.000000e+00> : vector<8xf32>
    %45 = vector.multi_reduction <add>, %44, %cst_38 [1] : vector<8x8xf32> to vector<8xf32>
    %46 = vector.shape_cast %45 : vector<8xf32> to vector<8x1xf32>
    %47 = tpu.reciprocal %46 {approx = true} : vector<8x1xf32> -> vector<8x1xf32>
    %48 = vector.broadcast %47 : vector<8x1xf32> to vector<8x8xf32>
    %49 = arith.mulf %44, %48 : vector<8x8xf32>
    %cst_39 = arith.constant dense<0.000000e+00> : vector<8x16xf32>
    %50 = tpu.matmul %49, %38, %cst_39 {dimension_numbers = #tpu.dot_dimension_numbers<[1], [0], [0], [1], [0, 0, 1, 1], [], []>} : vector<8x8xf32>, vector<8x16xf32>, vector<8x16xf32> -> vector<8x16xf32>
    %c1_40 = arith.constant 1 : index
    %c0_41 = arith.constant 0 : index
    %c0_42 = arith.constant 0 : index
    %51 = vector.load %arg7[%c1_40, %c0_41, %c0_42] : memref<2x16x128xf32, #tpu.memory_space<vmem>>, vector<1x16x128xf32>
    %52 = vector.shape_cast %51 : vector<1x16x128xf32> to vector<16x128xf32>
    %cst_43 = arith.constant dense<0.000000e+00> : vector<8x128xf32>
    %53 = tpu.matmul %50, %52, %cst_43 {dimension_numbers = #tpu.dot_dimension_numbers<[1], [0], [0], [1], [0, 0, 1, 1], [], []>} : vector<8x16xf32>, vector<16x128xf32>, vector<8x128xf32> -> vector<8x128xf32>
    %54 = arith.addf %29, %53 : vector<8x128xf32>
    %c0_44 = arith.constant 0 : index
    %c0_45 = arith.constant 0 : index
    %55 = vector.load %arg8[%c0_44, %c0_45] : memref<1x128xf32, #tpu.memory_space<vmem>>, vector<1x128xf32>
    %56 = vector.broadcast %55 : vector<1x128xf32> to vector<8x128xf32>
    %57 = arith.addf %54, %56 : vector<8x128xf32>
    %c0_46 = arith.constant 0 : index
    %c0_47 = arith.constant 0 : index
    %c0_48 = arith.constant 0 : index
    %58 = vector.load %arg9[%c0_46, %c0_47, %c0_48] : memref<1x8x128xf32, #tpu.memory_space<vmem>>, vector<1x8x128xf32>
    %59 = vector.shape_cast %58 : vector<1x8x128xf32> to vector<8x128xf32>
    %60 = vector.shape_cast %57 : vector<8x128xf32> to vector<1x8x128xf32>
    tpu.vector_store %arg9[%c0_46, %c0_47, %c0_48], %60 {strides = array<i32>} : memref<1x8x128xf32, #tpu.memory_space<vmem>>, vector<1x8x128xf32>,
    return
  }
  func.func @transform_0(%arg0: i32, %arg1: i32) -> (i32, i32, i32) {
    %c0_i32 = arith.constant 0 : i32
    %c0_i32_0 = arith.constant 0 : i32
    return %arg0, %arg1, %c0_i32 : i32, i32, i32
  }
  func.func @transform_1(%arg0: i32, %arg1: i32) -> (i32, i32, i32) {
    %c0_i32 = arith.constant 0 : i32
    %c0_i32_0 = arith.constant 0 : i32
    %c0_i32_1 = arith.constant 0 : i32
    return %arg0, %c0_i32, %c0_i32_0 : i32, i32, i32
  }
  func.func @transform_2(%arg0: i32, %arg1: i32) -> (i32, i32, i32) {
    %c0_i32 = arith.constant 0 : i32
    %c0_i32_0 = arith.constant 0 : i32
    %c0_i32_1 = arith.constant 0 : i32
    %c0_i32_2 = arith.constant 0 : i32
    return %c0_i32, %c0_i32_0, %c0_i32_1 : i32, i32, i32
  }
  func.func @transform_3(%arg0: i32, %arg1: i32) -> (i32, i32, i32) {
    %c0_i32 = arith.constant 0 : i32
    %c0_i32_0 = arith.constant 0 : i32
    %c0_i32_1 = arith.constant 0 : i32
    %c0_i32_2 = arith.constant 0 : i32
    return %c0_i32, %c0_i32_0, %c0_i32_1 : i32, i32, i32
  }
  func.func @transform_4(%arg0: i32, %arg1: i32) -> (i32, i32, i32) {
    %c0_i32 = arith.constant 0 : i32
    %c0_i32_0 = arith.constant 0 : i32
    %c0_i32_1 = arith.constant 0 : i32
    %c0_i32_2 = arith.constant 0 : i32
    return %c0_i32, %c0_i32_0, %c0_i32_1 : i32, i32, i32
  }
  func.func @transform_5(%arg0: i32, %arg1: i32) -> (i32, i32, i32) {
    %c0_i32 = arith.constant 0 : i32
    %c0_i32_0 = arith.constant 0 : i32
    %c0_i32_1 = arith.constant 0 : i32
    %c0_i32_2 = arith.constant 0 : i32
    return %c0_i32, %c0_i32_0, %c0_i32_1 : i32, i32, i32
  }
  func.func @transform_6(%arg0: i32, %arg1: i32) -> (i32, i32) {
    %c0_i32 = arith.constant 0 : i32
    %c0_i32_0 = arith.constant 0 : i32
    %c0_i32_1 = arith.constant 0 : i32
    return %c0_i32, %c0_i32_0 : i32, i32
  }
  func.func @transform_7(%arg0: i32, %arg1: i32) -> (i32, i32, i32) {
    %c0_i32 = arith.constant 0 : i32
    %c0_i32_0 = arith.constant 0 : i32
    return %arg0, %arg1, %c0_i32 : i32, i32, i32
  }
}

</mosaic_0001>

<bundles_post_ra>
// kernel: tpu_custom_call.1
= control target key start
LH: loop header
LB: loop body
LE: loop exit
PB: predicated region body
PF: predicated region fallthrough
CT: control target
= control target key end

     0   :  { %12 = vsyncpa [#allocation3], 0  ;;  %s2706_s0 = inlined_call_operand.vmem [shape: f32[2,8,128], index: 0, kind: input, shape index: {}]   ;;  %s2707_s1 = inlined_call_operand.vmem [shape: f32[2,8,128], index: 1, kind: input, shape index: {}]   ;;  %s2708_s2 = inlined_call_operand.vmem [shape: f32[2,128,16], index: 2, kind: input, shape index: {}]   ;;  %s2709_s3 = inlined_call_operand.vmem [shape: f32[2,128,16], index: 3, kind: input, shape index: {}]   ;;  %s2710_s4 = inlined_call_operand.vmem [shape: f32[2,128,16], index: 4, kind: input, shape index: {}]   ;;  %s2711_s5 = inlined_call_operand.vmem [shape: f32[2,16,128], index: 5, kind: input, shape index: {}]   ;;  %s2712_s6 = inlined_call_operand.vmem [shape: f32[1,128], index: 6, kind: input, shape index: {}]   ;;  %s2713_s7 = inlined_call_operand.hbm [shape: f32[2,8,128], index: 7, kind: output, shape index: {}]  }
   0x1   :  { %14 = vsyncpa [#allocation3 + $0x1], 0  ;;  %s2188_s24 = smov 0   ;;  %s2190_s25 = smov 0  }
   0x2   :  { %s2192_s26 = smov 0   ;;  %s2194_s27 = smov 0  }
   0x3   :  { %s2196_s28 = smov 0   ;;  %s2198_s29 = smov 0  }
   0x4 LB: > { %s1417_s30 = sadd.s32 4294967295, %s2142_s29   ;;  %s1418_s8 = sadd.s32 4294967294, %s2142_s29   ;;  %s2142_s29 = sphi %s2198_s29, %s20_s29   ;;  %s2138_s28 = sphi %s2196_s28, %s2720_s28   ;;  %s2134_s27 = sphi %s2194_s27, %s2719_s27   ;;  %s2130_s26 = sphi %s2192_s26, %s2718_s26   ;;  %s2126_s25 = sphi %s2190_s25, %s2717_s25   ;;  %s2122_s24 = sphi %s2188_s24, %s2716_s24  }
   0x5   : > { %s32_s9 = sadd.s32 1, %s2138_s28  ;;  %s200_s10 = sadd.s32 1, %s2130_s26 }
   0x6   : > { %p34_p0 = scmp.ge.s32.totalorder %s32_s9, 2  ;;  %p210_p1 = scmp.ne.s32.totalorder %s2130_s26, %s2126_s25 }
   0x7   : > { %p211_p2 = scmp.eq.s32.totalorder %s1417_s30, 1  ;;  %p216_p3 = scmp.ne.s32.totalorder %s2126_s25, %s2122_s24 }
   0x8   : > { %s2722_s9 = smov (%p34_p0, %s32_s9), 0  ;;  %p217_p5 = scmp.eq.s32.totalorder %s1418_s8, 1 }
   0x9   : > { %p2228_p4 = por %p211_p2, %p210_p1  ;;  %s195_s12 = ssub.s32 %s2138_s28, %s2722_s9 }
   0xa   : > { %p1421_p6 = scmp.ge.s32.totalorder %s2142_s29, 1  ;;  %p198_p7 = scmp.eq.s32.totalorder %s195_s12, 0 }
   0xb   : > { %p2235_p8 = por %p217_p5, %p216_p3  ;;  %p267_p9 = scmp.lt.s32.totalorder %s2142_s29, 3 }
   0xc   : > { %s2241_s14 = scalar_select %p198_p7, %s2130_s26, %s200_s10  }
   0xd   : > { %p268_p10 = pnand %p1421_p6, %p267_p9 }
   0xe   : > { %v404_v0 = vld [vmem:[%s2709_s3] sm:$0xff] (!%p268_p10)  ;;  %v405_v1 = vld [vmem:[%s2709_s3 + $0x8] sm:$0xff] (!%p268_p10)  ;;  %v2144_v3 = vmov (!%p268_p10), 0.0|0.0   ;;  %v406_v6 = vld [vmem:[%s2709_s3 + $0x10] sm:$0xff] (!%p268_p10)  ;;  %vm2145_vm0 = vmmov (!%p268_p10), 0   ;;  %v2146_v11 = vmov (!%p268_p10), 0.0  }
   0xf   : > { %271 = sbr.rel (%p268_p10) target bundleno = 2001 (0x7d1), region = 48  ;;  %v318_v2 = vld [vmem:[%s2708_s2] sm:$0xff] (!%p268_p10)  ;;  %1872 = vmatprep.subr.bf16.mxu1 (!%p268_p10), %v2144_v3  ;;  %v1873_v4 = vpack.c.bf16 (!%p268_p10), %v405_v1, %v404_v0  ;;  %1848 = vmatprep.subr.bf16.mxu0 (!%p268_p10), %v2144_v3  ;;  %v319_v5 = vld [vmem:[%s2708_s2 + $0x8] sm:$0xff] (!%p268_p10)  ;;  %v407_v7 = vld [vmem:[%s2709_s3 + $0x18] sm:$0xff] (!%p268_p10)  ;;  %p305_p11 = scmp.lt.s32.totalorder (!%p268_p10), %s2134_s27, 1  ;;  %vm576_vm1 = vcmask (!%p268_p10), 130048  }
  0x10   : > { %v1849_v8 = vpack.c.bf16 (!%p268_p10), %v319_v5, %v318_v2  ;;  %v320_v9 = vld [vmem:[%s2708_s2 + $0x10] sm:$0xff] (!%p268_p10)  ;;  %v321_v10 = vld [vmem:[%s2708_s2 + $0x18] sm:$0xff] (!%p268_p10)  ;;  %1671 = vmatprep.mubr.msk.f32.mxu1 (!%p268_p10), %vm2145_vm0, %v2146_v11  ;;  %1636 = vmatprep.mubr.msk.f32.mxu0 (!%p268_p10), %vm2145_vm0, %v2146_v11  ;;  %v1876_v12 = vpack.c.bf16 (!%p268_p10), %v407_v7, %v406_v6  ;;  %v408_v14 = vld [vmem:[%s2709_s3 + $0x20] sm:$0xff] (!%p268_p10)  ;;  %vm653_vm2 = vcmask (!%p268_p10), 64512   ;;  %s1485_s20 = sshll.u32 (!%p268_p10), %s2134_s27, 7 }
  0x11   : > { %1874 = vmatpush3.bf16.msra.mxu1 (!%p268_p10), %v1873_v4  ;;  %v1852_v13 = vpack.c.bf16 (!%p268_p10), %v321_v10, %v320_v9  ;;  %v409_v15 = vld [vmem:[%s2709_s3 + $0x28] sm:$0xff] (!%p268_p10)  ;;  %v322_v16 = vld [vmem:[%s2708_s2 + $0x20] sm:$0xff] (!%p268_p10)  ;;  %v410_v20 = vld [vmem:[%s2709_s3 + $0x30] sm:$0xff] (!%p268_p10)  ;;  %s2659_s30 = scalar_lea.hbm (!%p268_p10), %s2713_s7, %s1485_s20 }
  0x12   : > { %1850 = vmatpush3.bf16.msra.mxu0 (!%p268_p10), %v1849_v8  ;;  %1875 = vmatprep.subr.bf16.mxu1 (!%p268_p10), %v2144_v3  ;;  %v323_v17 = vld [vmem:[%s2708_s2 + $0x28] sm:$0xff] (!%p268_p10)  ;;  %v1879_v18 = vpack.c.bf16 (!%p268_p10), %v409_v15, %v408_v14  ;;  %v411_v21 = vld [vmem:[%s2709_s3 + $0x38] sm:$0xff] (!%p268_p10)  ;;  %v324_v22 = vld [vmem:[%s2708_s2 + $0x30] sm:$0xff] (!%p268_p10) }
  0x13   : > { %1851 = vmatprep.subr.bf16.mxu0 (!%p268_p10), %v2144_v3  ;;  %v1855_v19 = vpack.c.bf16 (!%p268_p10), %v323_v17, %v322_v16  ;;  %v325_v23 = vld [vmem:[%s2708_s2 + $0x38] sm:$0xff] (!%p268_p10)  ;;  %v1882_v24 = vpack.c.bf16 (!%p268_p10), %v411_v21, %v410_v20  ;;  %v412_v26 = vld [vmem:[%s2709_s3 + $0x40] sm:$0xff] (!%p268_p10)  ;;  %v413_v27 = vld [vmem:[%s2709_s3 + $0x48] sm:$0xff] (!%p268_p10) }
  0x14   : > { %v1858_v25 = vpack.c.bf16 (!%p268_p10), %v325_v23, %v324_v22  ;;  %v326_v28 = vld [vmem:[%s2708_s2 + $0x40] sm:$0xff] (!%p268_p10)  ;;  %v327_v29 = vld [vmem:[%s2708_s2 + $0x48] sm:$0xff] (!%p268_p10)  ;;  %v1885_v30 = vpack.c.bf16 (!%p268_p10), %v413_v27, %v412_v26  ;;  %v414_v32 = vld [vmem:[%s2709_s3 + $0x50] sm:$0xff] (!%p268_p10) }
  0x15   : > { %1877 = vmatpush3.bf16.msra.mxu1 (!%p268_p10), %v1876_v12  ;;  %v1861_v31 = vpack.c.bf16 (!%p268_p10), %v327_v29, %v326_v28  ;;  %v415_v33 = vld [vmem:[%s2709_s3 + $0x58] sm:$0xff] (!%p268_p10)  ;;  %v328_v34 = vld [vmem:[%s2708_s2 + $0x50] sm:$0xff] (!%p268_p10)  ;;  %v416_v38 = vld [vmem:[%s2709_s3 + $0x60] sm:$0xff] (!%p268_p10) }
  0x16   : > { %1853 = vmatpush3.bf16.msra.mxu0 %v1852_v13  ;;  %1878 = vmatprep.subr.bf16.mxu1 %v2144_v3  ;;  %v329_v35 = vld [vmem:[%s2708_s2 + $0x58] sm:$0xff]  ;;  %v1888_v36 = vpack.c.bf16 %v415_v33, %v414_v32  ;;  %v417_v39 = vld [vmem:[%s2709_s3 + $0x68] sm:$0xff]  ;;  %v330_v40 = vld [vmem:[%s2708_s2 + $0x60] sm:$0xff]  ;;  %s306_s19 = scalar_select %p305_p11, %s2134_s27, 1 }
  0x17   : > { %1854 = vmatprep.subr.bf16.mxu0 %v2144_v3  ;;  %v1864_v37 = vpack.c.bf16 %v329_v35, %v328_v34  ;;  %v331_v41 = vld [vmem:[%s2708_s2 + $0x68] sm:$0xff]  ;;  %v1891_v42 = vpack.c.bf16 %v417_v39, %v416_v38  ;;  %v418_v44 = vld [vmem:[%s2709_s3 + $0x70] sm:$0xff]  ;;  %v419_v45 = vld [vmem:[%s2709_s3 + $0x78] sm:$0xff]  ;;  %s2147_s27 = smov [#allocation2]  }
  0x18   : > { %v1867_v43 = vpack.c.bf16 %v331_v41, %v330_v40  ;;  %v332_v46 = vld [vmem:[%s2708_s2 + $0x70] sm:$0xff]  ;;  %v333_v47 = vld [vmem:[%s2708_s2 + $0x78] sm:$0xff]  ;;  %s1423_s15 = sshll.u32 %s306_s19, 3  ;;  %v1894_v48 = vpack.c.bf16 %v419_v45, %v418_v44  ;;  %v490_v56 = vld [vmem:[%s2710_s4] sm:$0xff]  ;;  %s2068_s12 = sshll.u32 %s2147_s27, 4  ;;  %s2069_s12 = int_to_ptr.vmem [resolvable:$false] %s2068_s12 }
  0x19   : > { %1880 = vmatpush3.bf16.msra.mxu1 %v1879_v18  ;;  %v1870_v49 = vpack.c.bf16 %v333_v47, %v332_v46  ;;  %s315_s18 = scalar_lea.vmem %s2707_s1, %s1423_s15  ;;  %s311_s22 = scalar_lea.vmem %s2706_s0, %s1423_s15  ;;  %v491_v57 = vld [vmem:[%s2710_s4 + $0x8] sm:$0xff]  ;;  %v492_v58 = vld [vmem:[%s2710_s4 + $0x10] sm:$0xff]  ;;  %v493_v60 = vld [vmem:[%s2710_s4 + $0x18] sm:$0xff] }
  0x1a   : > { %1856 = vmatpush3.bf16.msra.mxu0 %v1855_v19  ;;  %1881 = vmatprep.subr.bf16.mxu1 %v2144_v3  ;;  %v2367_v50 = vld [vmem:[%s315_s18] sm:$0xff]  ;;  %v1897_v59 = vpack.c.bf16 %v491_v57, %v490_v56  ;;  %v1900_v61 = vpack.c.bf16 %v493_v60, %v492_v58  ;;  %v495_v63 = vld [vmem:[%s2710_s4 + $0x28] sm:$0xff]  ;;  %v496_v1 = vld [vmem:[%s2710_s4 + $0x30] sm:$0xff]  ;;  %s302_s15 = sand.u32 1, %s2126_s25  }
  0x1b   : > { %1857 = vmatprep.subr.bf16.mxu0 %v2144_v3  ;;  %v2369_v51 = vld [vmem:[%s311_s22] sm:$0xff]  ;;  %v497_v2 = vld [vmem:[%s2710_s4 + $0x38] sm:$0xff]  ;;  %v499_v6 = vld [vmem:[%s2710_s4 + $0x48] sm:$0xff]  ;;  %s1422_s16 = sshll.u32 %s302_s15, 3  ;;  %s1320_s8 = scalar_lea.sflag [#allocation3], %s302_s15 }
  0x1c   : > { %v494_v62 = vld [vmem:[%s2710_s4 + $0x20] sm:$0xff]  ;;  %v1906_v4 = vpack.c.bf16 %v497_v2, %v496_v1  ;;  %v500_v8 = vld [vmem:[%s2710_s4 + $0x50] sm:$0xff]  ;;  %v501_v9 = vld [vmem:[%s2710_s4 + $0x58] sm:$0xff]  ;;  %s304_s21 = scalar_lea.vmem [#allocation2], %s1422_s16  ;;  %s2070_s16 = scalar_lea.vmem %s2069_s12, 256 }
  0x1d   : > { %1883 = vmatpush3.bf16.msra.mxu1 %v1882_v24  ;;  %v1903_v0 = vpack.c.bf16 %v495_v63, %v494_v62  ;;  %v498_v5 = vld [vmem:[%s2710_s4 + $0x40] sm:$0xff]  ;;  %v1912_v10 = vpack.c.bf16 %v501_v9, %v500_v8  ;;  %v503_v13 = vld [vmem:[%s2710_s4 + $0x68] sm:$0xff]  ;;  %v504_v15 = vld [vmem:[%s2710_s4 + $0x70] sm:$0xff]  ;;  %s1334_s22 = sshll.u32 %s304_s21, 4  ;;  %s2661_s22 = int_to_ptr.vmem [resolvable:$true] %s1334_s22 }
  0x1e   : > { %1859 = vmatpush3.bf16.msra.mxu0 %v1858_v25  ;;  %1884 = vmatprep.subr.bf16.mxu1 %v2144_v3  ;;  %v1909_v7 = vpack.c.bf16 %v499_v6, %v498_v5  ;;  %v502_v12 = vld [vmem:[%s2710_s4 + $0x60] sm:$0xff]  ;;  %v505_v16 = vld [vmem:[%s2710_s4 + $0x78] sm:$0xff]  ;;  %v1445_v27 = vld [vmem:[%s2709_s3 + $0x88] sm:$0xff]  ;;  %s2064_s10 = scalar_lea.vmem %s2661_s22, 128  ;;  %p2071_p1 = scmp.lt.s32.totalorder %s2661_s22, %s2069_s12 }
  0x1f   : > { %1860 = vmatprep.subr.bf16.mxu0 %v2144_v3  ;;  %v1915_v14 = vpack.c.bf16 %v503_v13, %v502_v12  ;;  %v1918_v17 = vpack.c.bf16 %v505_v16, %v504_v15  ;;  %v1444_v26 = vld [vmem:[%s2709_s3 + $0x80] sm:$0xff]  ;;  %v1447_v32 = vld [vmem:[%s2709_s3 + $0x98] sm:$0xff]  ;;  %v1449_v35 = vld [vmem:[%s2709_s3 + $0xa8] sm:$0xff]  ;;  %p2065_p12 = scmp.ne.s32.totalorder %s2661_s22, %s2064_s10  ;;  %p2072_p2 = scmp.lt.s32.totalorder %s2070_s16, %s2064_s10 }
  0x20   : > { %v1945_v28 = vpack.c.bf16 %v1445_v27, %v1444_v26  ;;  %v1448_v34 = vld [vmem:[%s2709_s3 + $0xa0] sm:$0xff]  ;;  %v1451_v38 = vld [vmem:[%s2709_s3 + $0xb8] sm:$0xff]  ;;  %v1453_v41 = vld [vmem:[%s2709_s3 + $0xc8] sm:$0xff] }
  0x21   : > { %1886 = vmatpush3.bf16.msra.mxu1 %v1885_v30  ;;  %v1452_v40 = vld [vmem:[%s2709_s3 + $0xc0] sm:$0xff]  ;;  %v1455_v44 = vld [vmem:[%s2709_s3 + $0xd8] sm:$0xff]  ;;  %v1457_v47 = vld [vmem:[%s2709_s3 + $0xe8] sm:$0xff]  ;;  %p2066_p13 = pnand %p2065_p12, %p2228_p4  ;;  %p2073_p3 = por %p2072_p2, %p2071_p1 }
  0x22   : > { %1862 = vmatpush3.bf16.msra.mxu0 %v1861_v31  ;;  %1887 = vmatprep.subr.bf16.mxu1 %v2144_v3  ;;  %v1446_v31 = vld [vmem:[%s2709_s3 + $0x90] sm:$0xff]  ;;  %v1456_v46 = vld [vmem:[%s2709_s3 + $0xe0] sm:$0xff]  ;;  %v1429_v56 = vld [vmem:[%s2708_s2 + $0x88] sm:$0xff] }
  0x23   : > { %1863 = vmatprep.subr.bf16.mxu0 %v2144_v3  ;;  %v1948_v33 = vpack.c.bf16 %v1447_v32, %v1446_v31  ;;  %v1430_v60 = vld [vmem:[%s2708_s2 + $0x90] sm:$0xff]  ;;  %v1432_v63 = vld [vmem:[%s2708_s2 + $0xa0] sm:$0xff]  ;;  %v1465_v26 = vld [vmem:[%s2710_s4 + $0xa8] sm:$0xff]  ;;  %p2067_p0 = pneg %p2066_p13 }
  0x24   : > { %v1434_v2 = vld [vmem:[%s2708_s2 + $0xb0] sm:$0xff]  ;;  %v1436_v6 = vld [vmem:[%s2708_s2 + $0xc0] sm:$0xff]  ;;  %v1469_v31 = vld [vmem:[%s2710_s4 + $0xc8] sm:$0xff] }
  0x25   : > { %1889 = vmatpush3.bf16.msra.mxu1 %v1888_v36  ;;  %v1951_v36 = vpack.c.bf16 %v1449_v35, %v1448_v34  ;;  %v1438_v9 = vld [vmem:[%s2708_s2 + $0xd0] sm:$0xff]  ;;  %v1440_v13 = vld [vmem:[%s2708_s2 + $0xe0] sm:$0xff]  ;;  %v1471_v34 = vld [vmem:[%s2710_s4 + $0xd8] sm:$0xff]  ;;  %p2074_p5 = pnand %p2073_p3, %p2067_p0 }
  0x26   : > { %1865 = vmatpush3.bf16.msra.mxu0 %v1864_v37  ;;  %1890 = vmatprep.subr.bf16.mxu1 %v2144_v3  ;;  %v1450_v37 = vld [vmem:[%s2709_s3 + $0xb0] sm:$0xff] }
  0x27   : > { %1866 = vmatprep.subr.bf16.mxu0 %v2144_v3  ;;  %v1954_v39 = vpack.c.bf16 %v1451_v38, %v1450_v37  ;;  %v1442_v16 = vld [vmem:[%s2708_s2 + $0xf0] sm:$0xff]  ;;  %v1473_v37 = vld [vmem:[%s2710_s4 + $0xe8] sm:$0xff] }
  0x29   : > { %1892 = vmatpush3.bf16.msra.mxu1 %v1891_v42  ;;  %v1957_v42 = vpack.c.bf16 %v1453_v41, %v1452_v40  ;;  %v1475_v40 = vld [vmem:[%s2710_s4 + $0xf8] sm:$0xff] }
  0x2a   : > { %1868 = vmatpush3.bf16.msra.mxu0 %v1867_v43  ;;  %1893 = vmatprep.subr.bf16.mxu1 %v2144_v3  ;;  %v1454_v43 = vld [vmem:[%s2709_s3 + $0xd0] sm:$0xff] }
  0x2b   : > { %1869 = vmatprep.subr.bf16.mxu0 %v2144_v3  ;;  %v1960_v45 = vpack.c.bf16 %v1455_v44, %v1454_v43  ;;  %v739_v43 = vld [vmem:[%s2711_s5 + $0x8] sm:$0xff] }
  0x2d   : > { %1895 = vmatpush3.bf16.msra.mxu1 %v1894_v48  ;;  %v1963_v48 = vpack.c.bf16 %v1457_v47, %v1456_v46 }
  0x2e   : > { %1871 = vmatpush3.bf16.msra.mxu0 %v1870_v49  ;;  %1709 = vmatprep.subr.mxu1 %v2146_v11  ;;  %v1458_v49 = vld [vmem:[%s2709_s3 + $0xf0] sm:$0xff] }
  0x2f   : > { %1896 = vmatprep.subr.bf16.mxu0 %v2144_v3 }
  0x30   : > { %1672 = vmatmul.mubr.f32.vlgmr.msra.gmra.mrb[0].mxu1 %v2367_v50 }
  0x31   : > { %1637 = vmatmul.mubr.f32.vlgmr.msra.gmra.mrb[0].mxu0 %v2369_v51  ;;  %1711 = vmatprep.mubr.msk.f32.mxu1 %vm2145_vm0, %v2146_v11 }
  0x32   : > { %1706 = vmatprep.mubr.msk.f32.mxu0 %vm2145_vm0, %v2146_v11  ;;  %1898 = vmatpush3.bf16.msra.mxu0 %v1897_v59 }
  0x33   : > { %1899 = vmatprep.subr.bf16.mxu0 %v2144_v3 }
  0x36   : > { %1901 = vmatpush3.bf16.msra.mxu0 %v1900_v61  ;;  %v1431_v61 = vld [vmem:[%s2708_s2 + $0x98] sm:$0xff] }
  0x37   : > { %1902 = vmatprep.subr.bf16.mxu0 %v2144_v3  ;;  %v1924_v62 = vpack.c.bf16 %v1431_v61, %v1430_v60 }
  0x3a   : > { %1904 = vmatpush3.bf16.msra.mxu0 %v1903_v0  ;;  %v1433_v0 = vld [vmem:[%s2708_s2 + $0xa8] sm:$0xff] }
  0x3b   : > { %1905 = vmatprep.subr.bf16.mxu0 %v2144_v3  ;;  %v1927_v1 = vpack.c.bf16 %v1433_v0, %v1432_v63 }
  0x3e   : > { %1907 = vmatpush3.bf16.msra.mxu0 %v1906_v4  ;;  %v1435_v4 = vld [vmem:[%s2708_s2 + $0xb8] sm:$0xff] }
  0x3f   : > { %1908 = vmatprep.subr.bf16.mxu0 %v2144_v3  ;;  %v1930_v5 = vpack.c.bf16 %v1435_v4, %v1434_v2 }
  0x42   : > { %1910 = vmatpush3.bf16.msra.mxu0 %v1909_v7  ;;  %v1437_v7 = vld [vmem:[%s2708_s2 + $0xc8] sm:$0xff] }
  0x43   : > { %1911 = vmatprep.subr.bf16.mxu0 %v2144_v3  ;;  %v1933_v8 = vpack.c.bf16 %v1437_v7, %v1436_v6 }
  0x46   : > { %1913 = vmatpush3.bf16.msra.mxu0 %v1912_v10  ;;  %v1439_v10 = vld [vmem:[%s2708_s2 + $0xd8] sm:$0xff] }
  0x47   : > { %1914 = vmatprep.subr.bf16.mxu0 %v2144_v3  ;;  %v1936_v12 = vpack.c.bf16 %v1439_v10, %v1438_v9  ;;  %v1483_v9 = vld [vmem:[%s2712_s6] ss:$0 sm:$0xff] }
  0x4a   : > { %1916 = vmatpush3.bf16.msra.mxu0 %v1915_v14  ;;  %v1441_v14 = vld [vmem:[%s2708_s2 + $0xe8] sm:$0xff] }
  0x4b   : > { %1917 = vmatprep.subr.bf16.mxu0 %v2144_v3  ;;  %v1939_v15 = vpack.c.bf16 %v1441_v14, %v1440_v13 }
  0x4e   : > { %1919 = vmatpush3.bf16.msra.mxu0 %v1918_v17  ;;  %v1443_v17 = vld [vmem:[%s2708_s2 + $0xf8] sm:$0xff] }
  0x4f   : > { %1944 = vmatprep.subr.bf16.mxu0 %v2144_v3 }
  0x51   : > { %1707 = vmatmul.mubr.f32.vlgmr.msra.gmra.mrb[2].mxu0 %v2367_v50 }
  0x52   : > { %1786 = vmatprep.mubr.msk.f32.mxu0 %vm2145_vm0, %v2146_v11  ;;  %1946 = vmatpush3.bf16.msra.mxu0 %v1945_v28  ;;  %v1467_v28 = vld [vmem:[%s2710_s4 + $0xb8] sm:$0xff] }
  0x53   : > { %1947 = vmatprep.subr.bf16.mxu0 %v2144_v3 }
  0x56   : > { %1949 = vmatpush3.bf16.msra.mxu0 %v1948_v33  ;;  %v1470_v33 = vld [vmem:[%s2710_s4 + $0xd0] sm:$0xff] }
  0x57   : > { %1950 = vmatprep.subr.bf16.mxu0 %v2144_v3  ;;  %v1984_v35 = vpack.c.bf16 %v1471_v34, %v1470_v33 }
  0x5a   : > { %1952 = vmatpush3.bf16.msra.mxu0 %v1951_v36  ;;  %v1472_v36 = vld [vmem:[%s2710_s4 + $0xe0] sm:$0xff] }
  0x5b   : > { %1953 = vmatprep.subr.bf16.mxu0 %v2144_v3  ;;  %v1987_v38 = vpack.c.bf16 %v1473_v37, %v1472_v36 }
  0x5e   : > { %1955 = vmatpush3.bf16.msra.mxu0 %v1954_v39  ;;  %v1474_v39 = vld [vmem:[%s2710_s4 + $0xf0] sm:$0xff] }
  0x5f   : > { %1956 = vmatprep.subr.bf16.mxu0 %v2144_v3  ;;  %v1990_v41 = vpack.c.bf16 %v1475_v40, %v1474_v39 }
  0x62   : > { %1958 = vmatpush3.bf16.msra.mxu0 %v1957_v42  ;;  %v738_v42 = vld [vmem:[%s2711_s5] sm:$0xff] }
  0x63   : > { %1959 = vmatprep.subr.bf16.mxu0 %v2144_v3  ;;  %v1996_v44 = vpack.c.bf16 %v739_v43, %v738_v42 }
  0x66   : > { %1961 = vmatpush3.bf16.msra.mxu0 %v1960_v45 }
  0x67   : > { %1962 = vmatprep.subr.bf16.mxu0 %v2144_v3 }
  0x6a   : > { %1964 = vmatpush3.bf16.msra.mxu0 %v1963_v48 }
  0x6b   : > { %1965 = vmatprep.subr.bf16.mxu0 %v2144_v3 }
 0x103   : > { %v486_v52 = vpop.f32.mrb[0].mxu1 }
 0x104   : > { %v1673_v53 = vpop.f32.mrb[1].mxu1  ;;  %1710 = vmatpush3.xpose.msk.msra.mxu1 %vm576_vm1, %v486_v52  ;;  %v400_v54 = vpop.f32.mrb[0].mxu0  ;;  %v1459_v52 = vld [vmem:[%s2709_s3 + $0xf8] sm:$0xff] }
 0x105   : > { %v1638_v55 = vpop.f32.mrb[1].mxu0  ;;  %1714 = vmatprep.subr.mxu1 %v2146_v11  ;;  %v1966_v53 = vpack.c.bf16 %v1459_v52, %v1458_v49 }
 0x106   : > { %v1428_v55 = vld [vmem:[%s2708_s2 + $0x80] sm:$0xff] }
 0x107   : > { %1712 = vmatmul.mubr.msk.f32.vlgmr.msra.gmra.mrb[2].mxu1 %vm576_vm1, %v400_v54  ;;  %1967 = vmatpush3.bf16.msra.mxu0 %v1966_v53  ;;  %v1921_v58 = vpack.c.bf16 %v1429_v56, %v1428_v55 }
 0x108   : > { %1716 = vmatprep.mubr.msk.f32.mxu1 %vm2145_vm0, %v2146_v11  ;;  %1824 = vmatprep.subr.mxu0 %v2146_v11 }
 0x10a   : > { %1787 = vmatmul.mubr.f32.vlgmr.msra.gmra.mrb[4].mxu0 %v2367_v50 }
 0x10b   : > { %1826 = vmatprep.mubr.msk.f32.mxu0 %vm2145_vm0, %v2146_v11 }
 0x124   : > { %v572_v29 = vpop.f32.mrb[2].mxu0 }
 0x125   : > { %v1708_v30 = vpop.f32.mrb[3].mxu0  ;;  %1715 = vmatpush3.msra.mxu1 %v572_v29 }
 0x126   : > { %1920 = vmatprep.subr.bf16.mxu1 %v2144_v3  ;;  %v1468_v30 = vld [vmem:[%s2710_s4 + $0xc0] sm:$0xff] }
 0x127   : > { %v1981_v32 = vpack.c.bf16 %v1469_v31, %v1468_v30 }
 0x1da   : > { %v649_v18 = vpop.f32.mrb[2].mxu1 }
 0x1db   : > { %v1713_v19 = vpop.f32.mrb[3].mxu1  ;;  %v654_v20 = vsel %vm653_vm2, %v649_v18, -inf }
 0x1dc   : > { %655 = vmax.xlane.f32.xlu0 %v654_v20  ;;  %v1460_v19 = vld [vmem:[%s2710_s4 + $0x80] sm:$0xff]  ;;  %v1461_v20 = vld [vmem:[%s2710_s4 + $0x88] sm:$0xff] }
 0x1dd   : > { %v910_v45 = vpop.f32.mrb[4].mxu0 }
 0x1de   : > { %v1788_v46 = vpop.f32.mrb[5].mxu0  ;;  %1825 = vmatpush3.xpose.msk.msra.mxu0 %vm576_vm1, %v910_v45 }
 0x1df   : > { %1829 = vmatprep.subr.mxu0 %v2146_v11 }
 0x269   : > { %v656_v21 = vpop.xlane.xlu0 %655 }
 0x26a   : > { %v657_v22 = vsub.f32 %v649_v18, %v656_v21  ;;  %v1942_v18 = vpack.c.bf16 %v1443_v17, %v1442_v16  ;;  %v1969_v21 = vpack.c.bf16 %v1461_v20, %v1460_v19 }
 0x26c   : > { %v658_v23 = vmul.f32 1.442695, %v657_v22  ;;  %v1462_v22 = vld [vmem:[%s2710_s4 + $0x90] sm:$0xff] }
 0x26e   : > { %2056 = vpow2.f32 %v658_v23  ;;  %v1463_v23 = vld [vmem:[%s2710_s4 + $0x98] sm:$0xff] }
 0x278   : > { %v2057_v24 = vpop.eup %2056 }
 0x279   : > { %v660_v25 = vsel %vm653_vm2, %v2057_v24, 0.0 }
 0x27a   : > { %661 = vadd.xlane.f32.xlu0 %v660_v25  ;;  %v1464_v25 = vld [vmem:[%s2710_s4 + $0xa0] sm:$0xff] }
 0x27b   : > { %v1975_v27 = vpack.c.bf16 %v1465_v26, %v1464_v25 }
 0x307   : > { %v662_v54 = vpop.xlane.xlu0 %661 }
 0x308   : > { %2058 = vrcp.f32 %v662_v54 }
 0x312   : > { %v2059_v57 = vpop.eup %2058 }
 0x313   : > { %v664_v59 = vmul.f32 %v2059_v57, %v2057_v24  ;;  %v1972_v24 = vpack.c.bf16 %v1463_v23, %v1462_v22 }
 0x315   : > { %1717 = vmatmul.mubr.msk.f32.vlgmr.msra.gmra.mrb[4].mxu1 %vm653_vm2, %v664_v59 }
 0x316   : > { %1922 = vmatpush3.bf16.msra.mxu1 %v1921_v58  ;;  %1751 = vmatprep.mubr.msk.f32.mxu1 %vm2145_vm0, %v2146_v11 }
 0x317   : > { %1923 = vmatprep.subr.bf16.mxu1 %v2144_v3 }
 0x31a   : > { %1925 = vmatpush3.bf16.msra.mxu1 %v1924_v62 }
 0x31b   : > { %1926 = vmatprep.subr.bf16.mxu1 %v2144_v3 }
 0x31e   : > { %1928 = vmatpush3.bf16.msra.mxu1 %v1927_v1  ;;  %v1480_v1 = vld [vmem:[%s2711_s5 + $0x18] sm:$0xff] }
 0x31f   : > { %1929 = vmatprep.subr.bf16.mxu1 %v2144_v3 }
 0x322   : > { %1931 = vmatpush3.bf16.msra.mxu1 %v1930_v5 }
 0x323   : > { %1932 = vmatprep.subr.bf16.mxu1 %v2144_v3 }
 0x326   : > { %1934 = vmatpush3.bf16.msra.mxu1 %v1933_v8 }
 0x327   : > { %1935 = vmatprep.subr.bf16.mxu1 %v2144_v3 }
 0x32a   : > { %1937 = vmatpush3.bf16.msra.mxu1 %v1936_v12 }
 0x32b   : > { %1938 = vmatprep.subr.bf16.mxu1 %v2144_v3 }
 0x32e   : > { %1940 = vmatpush3.bf16.msra.mxu1 %v1939_v15 }
 0x32f   : > { %1941 = vmatprep.subr.bf16.mxu1 %v2144_v3 }
 0x332   : > { %1943 = vmatpush3.bf16.msra.mxu1 %v1942_v18 }
 0x333   : > { %1968 = vmatprep.subr.bf16.mxu1 %v2144_v3 }
 0x335   : > { %1752 = vmatmul.mubr.f32.vlgmr.msra.gmra.mrb[6].mxu1 %v2369_v51  ;;  %v1466_v51 = vld [vmem:[%s2710_s4 + $0xb0] sm:$0xff] }
 0x336   : > { %1970 = vmatpush3.bf16.msra.mxu1 %v1969_v21  ;;  %1821 = vmatprep.mubr.msk.f32.mxu1 %vm2145_vm0, %v2146_v11  ;;  %v1978_v29 = vpack.c.bf16 %v1467_v28, %v1466_v51 }
 0x337   : > { %1971 = vmatprep.subr.bf16.mxu1 %v2144_v3 }
 0x33a   : > { %1973 = vmatpush3.bf16.msra.mxu1 %v1972_v24 }
 0x33b   : > { %1974 = vmatprep.subr.bf16.mxu1 %v2144_v3 }
 0x33e   : > { %1976 = vmatpush3.bf16.msra.mxu1 %v1975_v27 }
 0x33f   : > { %1977 = vmatprep.subr.bf16.mxu1 %v2144_v3 }
 0x342   : > { %1979 = vmatpush3.bf16.msra.mxu1 %v1978_v29 }
 0x343   : > { %1980 = vmatprep.subr.bf16.mxu1 %v2144_v3 }
 0x346   : > { %1982 = vmatpush3.bf16.msra.mxu1 %v1981_v32 }
 0x347   : > { %1983 = vmatprep.subr.bf16.mxu1 %v2144_v3 }
 0x34a   : > { %1985 = vmatpush3.bf16.msra.mxu1 %v1984_v35 }
 0x34b   : > { %1986 = vmatprep.subr.bf16.mxu1 %v2144_v3 }
 0x34e   : > { %1988 = vmatpush3.bf16.msra.mxu1 %v1987_v38 }
 0x34f   : > { %1989 = vmatprep.subr.bf16.mxu1 %v2144_v3 }
 0x352   : > { %1991 = vmatpush3.bf16.msra.mxu1 %v1990_v41 }
 0x353   : > { %1995 = vmatprep.subr.bf16.mxu1 %v2144_v3 }
 0x355   : > { %1822 = vmatmul.mubr.f32.vlgmr.msra.gmra.mrb[8].mxu1 %v2367_v50 }
 0x356   : > { %1997 = vmatpush3.bf16.msra.mxu1 %v1996_v44  ;;  %1845 = vmatprep.mubr.msk.f32.mxu1 %vm2145_vm0, %v2146_v11 }
 0x3e8   : > { %v734_v47 = vpop.f32.mrb[4].mxu1 }
 0x3e9   : > { %v1718_v48 = vpop.f32.mrb[5].mxu1  ;;  %1846 = vmatmul.mubr.msk.f32.vlgmr.msra.gmra.mrb[10].mxu1 %vm576_vm1, %v734_v47 }
 0x408   : > { %v823_v49 = vpop.f32.mrb[6].mxu1 }
 0x409   : > { %v1753_v52 = vpop.f32.mrb[7].mxu1  ;;  %1827 = vmatmul.mubr.msk.f32.vlgmr.msra.gmra.mrb[6].mxu0 %vm576_vm1, %v823_v49 }
 0x40a   : > { %1831 = vmatprep.mubr.msk.f32.mxu0 %vm2145_vm0, %v2146_v11 }
 0x428   : > { %v997_v50 = vpop.f32.mrb[8].mxu1 }
 0x429   : > { %v1823_v53 = vpop.f32.mrb[9].mxu1  ;;  %1830 = vmatpush3.msra.mxu0 %v997_v50 }
 0x42a   : > { %1992 = vmatprep.subr.bf16.mxu0 %v2144_v3  ;;  %v1479_v3 = vld [vmem:[%s2711_s5 + $0x10] sm:$0xff] }
 0x42b   : > { %v1993_v4 = vpack.c.bf16 %v1480_v1, %v1479_v3 }
 0x4bc   : > { %v1306_v54 = vpop.f32.mrb[10].mxu1 }
 0x4bd   : > { %v1847_v55 = vpop.f32.mrb[11].mxu1 }
 0x4dc   : > { %v1073_v56 = vpop.f32.mrb[6].mxu0 }
 0x4dd   : > { %v1828_v57 = vpop.f32.mrb[7].mxu0  ;;  %v1077_v58 = vsel %vm653_vm2, %v1073_v56, -inf }
 0x4de   : > { %1078 = vmax.xlane.f32.xlu1 %v1077_v58 }
 0x56b   : > { %v1079_v59 = vpop.xlane.xlu1 %1078 }
 0x56c   : > { %v1080_v60 = vsub.f32 %v1073_v56, %v1079_v59 }
 0x56e   : > { %v1081_v61 = vmul.f32 1.442695, %v1080_v60 }
 0x570   : > { %2060 = vpow2.f32 %v1081_v61 }
 0x57a   : > { %v2061_v62 = vpop.eup %2060 }
 0x57b   : > { %v1083_v63 = vsel %vm653_vm2, %v2061_v62, 0.0 }
 0x57c   : > { %1084 = vadd.xlane.f32.xlu1 %v1083_v63 }
 0x609   : > { %v1085_v0 = vpop.xlane.xlu1 %1084 }
 0x60a   : > { %2062 = vrcp.f32 %v1085_v0 }
 0x614   : > { %v2063_v2 = vpop.eup %2062 }
 0x615   : > { %v1087_v5 = vmul.f32 %v2063_v2, %v2061_v62 }
 0x617   : > { %1832 = vmatmul.mubr.msk.f32.vlgmr.msra.gmra.mrb[8].mxu0 %vm653_vm2, %v1087_v5 }
 0x618   : > { %1994 = vmatpush3.bf16.msra.mxu0 %v1993_v4  ;;  %1838 = vmatprep.mubr.msk.f32.mxu0 %vm2145_vm0, %v2146_v11 }
 0x6ea   : > { %v1157_v6 = vpop.f32.mrb[8].mxu0 }
 0x6eb   : > { %v1833_v7 = vpop.f32.mrb[9].mxu0  ;;  %1839 = vmatmul.mubr.msk.f32.vlgmr.msra.gmra.mrb[10].mxu0 %vm576_vm1, %v1157_v6 }
 0x7be   : > { %v1233_v8 = vpop.f32.mrb[10].mxu0 }
 0x7bf   : > { %v1307_v10 = vadd.f32 %v1306_v54, %v1233_v8  ;;  %v1840_v12 = vpop.f32.mrb[11].mxu0 }
 0x7c1   : > { %v1317_v13 = vadd.f32 %v1483_v9, %v1307_v10 }
 0x7c3   : > { %1318 = vst [vmem:[%s304_s21] sm:$0xff] %v1317_v13 }
 0x7c4   : > { %2077 = shalt.err (!%p2074_p5)
}
 0x7c5   : > { %s2078_s15 = scalar_lea.hbm %s2659_s30, 128  ;;  %s2082_s20 = scalar_lea.hbm %s2713_s7, 256 }
 0x7c6   : > { %p2079_p6 = scmp.ne.s32.totalorder %s2659_s30, %s2078_s15  ;;  %p2083_p10 = scmp.lt.u32.totalorder %s2659_s30, %s2713_s7 }
 0x7c7   : > { %p2084_p11 = scmp.lt.u32.totalorder %s2082_s20, %s2078_s15  ;;  %p2086_p13 = scmp.lt.u32.totalorder %s2078_s15, %s2659_s30 }
 0x7c8   : > { %p2080_p7 = pnand %p2079_p6, %p2228_p4 }
 0x7c9   : > { %p2085_p12 = por %p2084_p11, %p2083_p10 }
 0x7ca   : > { %p2081_p9 = pneg %p2080_p7 }
 0x7cb   : > { %p2087_p0 = por %p2086_p13, %p2085_p12 }
 0x7cd   : > { %p2088_p1 = pnand %p2087_p0, %p2081_p9 }
 0x7cf   : > { %2091 = shalt.err (!%p2088_p1)
}
 0x7d0   : > { %1998 = dma.vmem_to_hbm [thread:$0]  (%p2228_p4), %s2661_s22, 128, %s2659_s30, %s1320_s8  }
 0x7d1 PF: > { %p2004_p2 = scmp.ge.s32.totalorder %s2142_s29, 2  ;;  %s1346_s23 = sand.u32 1, %s2122_s24  }
 0x7d2   : > { %s1347_s10 = scalar_lea.sflag [#allocation3], %s1346_s23 }
 0x7d3   : > { %p2001_p3 = pnand %p2004_p2, %p2235_p8 }
 0x7d5   : > { %2117 = dma.done.wait (!%p2001_p3), %s1347_s10, 128  }
 0x7d6   : > { %2119 = vsyncadd (!%p2001_p3), %s1347_s10, 4294967168  ;;  %s20_s29 = sadd.s32 1, %s2142_s29   ;;  %s2716_s24 = smov %s2126_s25 }
 0x7d7   : > { %p17_p5 = scmp.ge.s32.totalorder %s20_s29, 4   ;;  %s2717_s25 = smov %s2130_s26 }
 0x7d8   : > { %s2718_s26 = smov %s2241_s14  ;;  %s2719_s27 = smov %s2138_s28 }
 0x7d9   : > { %s2720_s28 = smov %s2722_s9  ;;  %19 = sbr.rel (!%p17_p5) target bundleno = 4 (0x4), region = 90 }
 0x7e0   :  { %1352 = vsyncpa [#allocation3], 1 }
 0x7e1   :  { %1354 = vsyncpa [#allocation3 + $0x1], 1 }

</bundles_post_ra>
